<compile_context>
chip_gen: v7x
topology: tpu7x:2x2x1
jax: 0.10.0
libtpu: 0.0.40
codegen_flags: <defaults>
</compile_context>

<pallas_src>
import functools

import jax
import jax.numpy as jnp
from jax.experimental import pallas as pl
from jax.experimental.pallas import tpu as pltpu


def block_kernel(x_ref, w1_ref, w2_ref, bn_ref, mask_ref, o_ref, *,
                 n, h, w, eps):
    """Fused Block forward, single invocation (whole batch resident in VMEM).

    x_ref    : (Cin_p, M)      f32   channels-first input, M = N*H*W, Cin padded to 8k
    w1_ref   : (Cout, 9*Cin_p) bf16  conv1 weight, cols ordered (kh, kw, cin)
    w2_ref   : (Cout, 9*Cout)  bf16  conv2 weight
    bn_ref   : (Cout, 4)       f32   packed per-channel [g1, b1, g2, b2]
    mask_ref : (8, M)          f32   {0,1} halo masks for the 8 non-center taps
    o_ref    : (Cout, M)       f32   channels-first output
    """
    H, W = h, w
    M = n * H * W

    def im2col_bf16(a):
        """a: (C, M) f32 -> (9*C, M) bf16, rows ordered (kh, kw, c).

        Zero-padding halo handled by the precomputed {0,1} masks (loaded from
        VMEM at use -- cheap vld, no vregs pinned, no index arithmetic).
        Each tap is masked + cast to bf16 before the concat (smaller live set).
        """
        taps = []
        k = 0
        for dr in (-1, 0, 1):
            for dc in (-1, 0, 1):
                s = dr * W + dc                      # tap reads a[:, m + s]
                if s == 0:
                    taps.append(a.astype(jnp.bfloat16))
                else:
                    t = pltpu.roll(a, shift=(-s) % M, axis=1)
                    # TODO(synk): on v6e/v7x a bf16 {0,1} multiply here is
                    # slightly cheaper; f32 mask kept for v5e friendliness.
                    taps.append((t * mask_ref[k:k + 1, :]).astype(jnp.bfloat16))
                    k += 1
        return jnp.concatenate(taps, axis=0)         # (9*C, M) bf16

    inv_m = jnp.float32(1.0 / M)

    def bn_affine(hpre, g, b, relu):
        """Training-mode BN (single-pass sum & sum-of-squares), optional ReLU."""
        # TODO(synk): at real M (tens of thousands of positions) switch to a
        # mean-shifted / two-pass variance to avoid E[x^2]-E[x]^2 cancellation.
        s = jnp.sum(hpre, axis=1, keepdims=True)               # (Cout, 1)
        sq = jnp.sum(hpre * hpre, axis=1, keepdims=True)       # (Cout, 1)
        mean = s * inv_m
        var = sq * inv_m - mean * mean                         # biased variance
        scale = g * jax.lax.rsqrt(var + eps)
        shift = b - mean * scale
        y = hpre * scale + shift
        return jnp.maximum(y, 0.0) if relu else y

    g1 = bn_ref[:, 0:1]
    b1 = bn_ref[:, 1:2]
    g2 = bn_ref[:, 2:3]
    b2 = bn_ref[:, 3:4]

    x = x_ref[...]                                             # (Cin_p, M) f32

    # ---- conv1 (3x3, stride=1, pad=1) as one MXU matmul ---------------------
    # conv bias omitted: training-mode BN mean subtraction cancels it exactly.
    h1 = jnp.dot(w1_ref[...], im2col_bf16(x),
                 preferred_element_type=jnp.float32)           # (Cout, M) f32
    a1 = bn_affine(h1, g1, b1, relu=True)

    # ---- conv2 (3x3, stride=1, pad=1): taps built straight from registers ---
    h2 = jnp.dot(w2_ref[...], im2col_bf16(a1),
                 preferred_element_type=jnp.float32)           # (Cout, M) f32
    y = bn_affine(h2, g2, b2, relu=False)

    # shortcut: this Block config has short=None -> adds 0.
    o_ref[...] = jnp.maximum(y, 0.0).astype(o_ref.dtype)       # lane-dense vst


def block_forward(x_nchw, params, *, stride=1, eps=1e-5):
    """NCHW in / NCHW out, matching the PyTorch module (training-mode BN)."""
    N, Cin, H, W = x_nchw.shape
    Cout = params["w1"].shape[-1]
    M = N * H * W
    if stride != 1:
        # TODO(synk): strided conv1 (stride>1) is not implemented in this
        # lane-flattened kernel; the exercised Block config uses stride=1.
        raise NotImplementedError("Pallas Block kernel supports stride=1 only")

    # ---- channels-first, sublane-aligned input: (Cin_p, N*H*W) --------------
    cin_p = ((Cin + 7) // 8) * 8                     # pad Cin to a sublane multiple
    x_cm = jnp.transpose(x_nchw.astype(jnp.float32), (1, 0, 2, 3)).reshape(Cin, M)
    if cin_p != Cin:
        x_cm = jnp.pad(x_cm, ((0, cin_p - Cin), (0, 0)))

    # Conv weights -> (Cout, 9*C) bf16 MXU operands (K ordered (kh, kw, c)).
    w1p = jnp.pad(params["w1"], ((0, 0), (0, 0), (0, cin_p - Cin), (0, 0)))
    w1t = jnp.transpose(w1p.reshape(9 * cin_p, Cout)).astype(jnp.bfloat16)
    w2t = jnp.transpose(params["w2"].reshape(9 * Cout, Cout)).astype(jnp.bfloat16)

    # Packed BN gamma/beta for both layers: (Cout, 4).
    bn = jnp.stack([params["g1"].reshape(-1), params["b1"].reshape(-1),
                    params["g2"].reshape(-1), params["b2"].reshape(-1)],
                   axis=1).astype(jnp.float32)

    # Precomputed {0,1} halo masks for the 8 non-center taps: (8, M) f32.
    hw = jnp.arange(H * W, dtype=jnp.int32)
    i_idx, j_idx = hw // W, hw % W
    rows = []
    for dr in (-1, 0, 1):
        for dc in (-1, 0, 1):
            if dr == 0 and dc == 0:
                continue
            ok = ((i_idx + dr >= 0) & (i_idx + dr < H) &
                  (j_idx + dc >= 0) & (j_idx + dc < W))
            rows.append(jnp.tile(ok, N))             # same pattern per image
    masks = jnp.stack(rows, axis=0).astype(jnp.float32)        # (8, M)

    kernel = functools.partial(block_kernel, n=N, h=H, w=W, eps=eps)
    vmem = pl.BlockSpec(memory_space=pltpu.MemorySpace.VMEM)

    flops = 2 * M * Cout * 9 * cin_p + 2 * M * Cout * 9 * Cout
    bytes_accessed = (x_cm.size * 4 + w1t.size * 2 + w2t.size * 2 +
                      bn.size * 4 + masks.size * 4 + Cout * M * 4)

    out_cm = pl.pallas_call(
        kernel,
        out_shape=jax.ShapeDtypeStruct((Cout, M), jnp.float32),
        in_specs=[vmem, vmem, vmem, vmem, vmem],
        out_specs=vmem,
        cost_estimate=pl.CostEstimate(flops=flops,
                                      transcendentals=2 * Cout,
                                      bytes_accessed=bytes_accessed),
    )(x_cm, w1t, w2t, bn, masks)

    # (Cout, N*HW) -> NCHW: tiny wrapper-side layout plumbing (~8 KB here).
    return jnp.transpose(out_cm.reshape(Cout, N, H, W), (1, 0, 2, 3))


def block_reference(x_nchw, params, *, stride=1, eps=1e-5):
    """Pure-JAX f32 reference with exact PyTorch-module math (incl. conv bias)."""
    x = jnp.transpose(x_nchw, (0, 2, 3, 1)).astype(jnp.float32)

    def conv(x, w, b, s):
        y = jax.lax.conv_general_dilated(
            x, w, (s, s), [(1, 1), (1, 1)],
            dimension_numbers=("NHWC", "HWIO", "NHWC"))
        return y + b

    def bn(x, g, b):
        mu = jnp.mean(x, axis=(0, 1, 2), keepdims=True)
        var = jnp.mean((x - mu) ** 2, axis=(0, 1, 2), keepdims=True)
        return (x - mu) * jax.lax.rsqrt(var + eps) * g + b

    h = jax.nn.relu(bn(conv(x, params["w1"], params["bc1"], stride),
                       params["g1"], params["b1"]))
    h = bn(conv(h, params["w2"], params["bc2"], 1), params["g2"], params["b2"])
    h = jax.nn.relu(h + 0.0)
    return jnp.transpose(h, (0, 3, 1, 2))


def init_params(key, cin, cout):
    ks = jax.random.split(key, 8)
    return {
        "w1":  0.1 * jax.random.normal(ks[0], (3, 3, cin, cout), jnp.float32),
        "bc1": 0.1 * jax.random.normal(ks[1], (1, cout), jnp.float32),
        "g1":  1.0 + 0.1 * jax.random.normal(ks[2], (1, cout), jnp.float32),
        "b1":  0.1 * jax.random.normal(ks[3], (1, cout), jnp.float32),
        "w2":  0.1 * jax.random.normal(ks[4], (3, 3, cout, cout), jnp.float32),
        "bc2": 0.1 * jax.random.normal(ks[5], (1, cout), jnp.float32),
        "g2":  1.0 + 0.1 * jax.random.normal(ks[6], (1, cout), jnp.float32),
        "b2":  0.1 * jax.random.normal(ks[7], (1, cout), jnp.float32),
    }


if __name__ == "__main__":
    # Block(in_channels=4, out_channels=8, stride=1, short=None)
    N, CIN, COUT, H, W, STRIDE = 2, 4, 8, 16, 16, 1

    key = jax.random.PRNGKey(0)
    kx, kp = jax.random.split(key)
    x = jax.random.normal(kx, (N, CIN, H, W), jnp.float32)       # NCHW, as in PyTorch
    params = init_params(kp, CIN, COUT)

    out = jax.block_until_ready(block_forward(x, params, stride=STRIDE))
    ref = jax.block_until_ready(block_reference(x, params, stride=STRIDE))

    assert out.shape == (N, COUT, H, W), out.shape
    # bf16 MXU operands (f32 accumulation) vs an all-f32 reference -> bf16-level tolerance.
    max_err = float(jnp.max(jnp.abs(out - ref)))
    assert jnp.allclose(out, ref, atol=3e-2, rtol=3e-2), max_err

    print("KERNEL_OK")
</pallas_src>

<mosaic_0001>
module attributes {stable_mosaic.version = 11 : i64} {
  func.func @block_kernel(%arg0: memref<8x512xf32, #tpu.memory_space<vmem>>, %arg1: memref<8x72xbf16, #tpu.memory_space<vmem>>, %arg2: memref<8x72xbf16, #tpu.memory_space<vmem>>, %arg3: memref<8x4xf32, #tpu.memory_space<vmem>>, %arg4: memref<8x512xf32, #tpu.memory_space<vmem>>, %arg5: memref<8x512xf32, #tpu.memory_space<vmem>>) attributes {dimension_semantics = [], scalar_prefetch = 0 : i64, scratch_operands = 0 : i64, tpu.core_type = #tpu.core_type<tc>} {
    %c0 = arith.constant 0 : index
    %c0_0 = arith.constant 0 : index
    %0 = vector.load %arg3[%c0, %c0_0] : memref<8x4xf32, #tpu.memory_space<vmem>>, vector<8x1xf32>
    %c0_1 = arith.constant 0 : index
    %c1 = arith.constant 1 : index
    %1 = vector.load %arg3[%c0_1, %c1] : memref<8x4xf32, #tpu.memory_space<vmem>>, vector<8x1xf32>
    %c0_2 = arith.constant 0 : index
    %c2 = arith.constant 2 : index
    %2 = vector.load %arg3[%c0_2, %c2] : memref<8x4xf32, #tpu.memory_space<vmem>>, vector<8x1xf32>
    %c0_3 = arith.constant 0 : index
    %c3 = arith.constant 3 : index
    %3 = vector.load %arg3[%c0_3, %c3] : memref<8x4xf32, #tpu.memory_space<vmem>>, vector<8x1xf32>
    %c0_4 = arith.constant 0 : index
    %c0_5 = arith.constant 0 : index
    %4 = vector.load %arg0[%c0_4, %c0_5] : memref<8x512xf32, #tpu.memory_space<vmem>>, vector<8x512xf32>
    %c0_6 = arith.constant 0 : index
    %c0_7 = arith.constant 0 : index
    %5 = vector.load %arg1[%c0_6, %c0_7] : memref<8x72xbf16, #tpu.memory_space<vmem>>, vector<8x72xbf16>
    %c17_i32 = arith.constant 17 : i32
    %6 = tpu.dynamic_rotate %4 by %c17_i32 dim 1 : vector<8x512xf32>, i32 -> vector<8x512xf32>
    %c0_8 = arith.constant 0 : index
    %c0_9 = arith.constant 0 : index
    %7 = vector.load %arg4[%c0_8, %c0_9] : memref<8x512xf32, #tpu.memory_space<vmem>>, vector<1x512xf32>
    %8 = vector.broadcast %7 : vector<1x512xf32> to vector<8x512xf32>
    %9 = arith.mulf %6, %8 : vector<8x512xf32>
    %10 = arith.truncf %9 : vector<8x512xf32> to vector<8x512xbf16>
    %c16_i32 = arith.constant 16 : i32
    %11 = tpu.dynamic_rotate %4 by %c16_i32 dim 1 : vector<8x512xf32>, i32 -> vector<8x512xf32>
    %c1_10 = arith.constant 1 : index
    %c0_11 = arith.constant 0 : index
    %12 = vector.load %arg4[%c1_10, %c0_11] : memref<8x512xf32, #tpu.memory_space<vmem>>, vector<1x512xf32>
    %13 = vector.broadcast %12 : vector<1x512xf32> to vector<8x512xf32>
    %14 = arith.mulf %11, %13 : vector<8x512xf32>
    %15 = arith.truncf %14 : vector<8x512xf32> to vector<8x512xbf16>
    %c15_i32 = arith.constant 15 : i32
    %16 = tpu.dynamic_rotate %4 by %c15_i32 dim 1 : vector<8x512xf32>, i32 -> vector<8x512xf32>
    %c2_12 = arith.constant 2 : index
    %c0_13 = arith.constant 0 : index
    %17 = vector.load %arg4[%c2_12, %c0_13] : memref<8x512xf32, #tpu.memory_space<vmem>>, vector<1x512xf32>
    %18 = vector.broadcast %17 : vector<1x512xf32> to vector<8x512xf32>
    %19 = arith.mulf %16, %18 : vector<8x512xf32>
    %20 = arith.truncf %19 : vector<8x512xf32> to vector<8x512xbf16>
    %c1_i32 = arith.constant 1 : i32
    %21 = tpu.dynamic_rotate %4 by %c1_i32 dim 1 : vector<8x512xf32>, i32 -> vector<8x512xf32>
    %c3_14 = arith.constant 3 : index
    %c0_15 = arith.constant 0 : index
    %22 = vector.load %arg4[%c3_14, %c0_15] : memref<8x512xf32, #tpu.memory_space<vmem>>, vector<1x512xf32>
    %23 = vector.broadcast %22 : vector<1x512xf32> to vector<8x512xf32>
    %24 = arith.mulf %21, %23 : vector<8x512xf32>
    %25 = arith.truncf %24 : vector<8x512xf32> to vector<8x512xbf16>
    %26 = arith.truncf %4 : vector<8x512xf32> to vector<8x512xbf16>
    %c511_i32 = arith.constant 511 : i32
    %27 = tpu.dynamic_rotate %4 by %c511_i32 dim 1 : vector<8x512xf32>, i32 -> vector<8x512xf32>
    %c4 = arith.constant 4 : index
    %c0_16 = arith.constant 0 : index
    %28 = vector.load %arg4[%c4, %c0_16] : memref<8x512xf32, #tpu.memory_space<vmem>>, vector<1x512xf32>
    %29 = vector.broadcast %28 : vector<1x512xf32> to vector<8x512xf32>
    %30 = arith.mulf %27, %29 : vector<8x512xf32>
    %31 = arith.truncf %30 : vector<8x512xf32> to vector<8x512xbf16>
    %c497_i32 = arith.constant 497 : i32
    %32 = tpu.dynamic_rotate %4 by %c497_i32 dim 1 : vector<8x512xf32>, i32 -> vector<8x512xf32>
    %c5 = arith.constant 5 : index
    %c0_17 = arith.constant 0 : index
    %33 = vector.load %arg4[%c5, %c0_17] : memref<8x512xf32, #tpu.memory_space<vmem>>, vector<1x512xf32>
    %34 = vector.broadcast %33 : vector<1x512xf32> to vector<8x512xf32>
    %35 = arith.mulf %32, %34 : vector<8x512xf32>
    %36 = arith.truncf %35 : vector<8x512xf32> to vector<8x512xbf16>
    %c496_i32 = arith.constant 496 : i32
    %37 = tpu.dynamic_rotate %4 by %c496_i32 dim 1 : vector<8x512xf32>, i32 -> vector<8x512xf32>
    %c6 = arith.constant 6 : index
    %c0_18 = arith.constant 0 : index
    %38 = vector.load %arg4[%c6, %c0_18] : memref<8x512xf32, #tpu.memory_space<vmem>>, vector<1x512xf32>
    %39 = vector.broadcast %38 : vector<1x512xf32> to vector<8x512xf32>
    %40 = arith.mulf %37, %39 : vector<8x512xf32>
    %41 = arith.truncf %40 : vector<8x512xf32> to vector<8x512xbf16>
    %c495_i32 = arith.constant 495 : i32
    %42 = tpu.dynamic_rotate %4 by %c495_i32 dim 1 : vector<8x512xf32>, i32 -> vector<8x512xf32>
    %c7 = arith.constant 7 : index
    %c0_19 = arith.constant 0 : index
    %43 = vector.load %arg4[%c7, %c0_19] : memref<8x512xf32, #tpu.memory_space<vmem>>, vector<1x512xf32>
    %44 = vector.broadcast %43 : vector<1x512xf32> to vector<8x512xf32>
    %45 = arith.mulf %42, %44 : vector<8x512xf32>
    %46 = arith.truncf %45 : vector<8x512xf32> to vector<8x512xbf16>
    %47 = tpu.concatenate %10, %15, %20, %25, %26, %31, %36, %41, %46 in 0 : vector<8x512xbf16>, vector<8x512xbf16>, vector<8x512xbf16>, vector<8x512xbf16>, vector<8x512xbf16>, vector<8x512xbf16>, vector<8x512xbf16>, vector<8x512xbf16>, vector<8x512xbf16> -> vector<72x512xbf16>
    %cst = arith.constant dense<0.000000e+00> : vector<8x512xf32>
    %48 = tpu.matmul %5, %47, %cst {dimension_numbers = #tpu.dot_dimension_numbers<[1], [0], [0], [1], [0, 0, 1, 1], [], []>} : vector<8x72xbf16>, vector<72x512xbf16>, vector<8x512xf32> -> vector<8x512xf32>
    %cst_20 = arith.constant dense<0.000000e+00> : vector<8xf32>
    %49 = vector.multi_reduction <add>, %48, %cst_20 [1] : vector<8x512xf32> to vector<8xf32>
    %50 = vector.shape_cast %49 : vector<8xf32> to vector<8x1xf32>
    %51 = arith.mulf %48, %48 : vector<8x512xf32>
    %cst_21 = arith.constant dense<0.000000e+00> : vector<8xf32>
    %52 = vector.multi_reduction <add>, %51, %cst_21 [1] : vector<8x512xf32> to vector<8xf32>
    %53 = vector.shape_cast %52 : vector<8xf32> to vector<8x1xf32>
    %cst_22 = arith.constant 0.001953125 : f32
    %54 = vector.broadcast %cst_22 : f32 to vector<8x1xf32>
    %55 = arith.mulf %50, %54 : vector<8x1xf32>
    %cst_23 = arith.constant 0.001953125 : f32
    %56 = vector.broadcast %cst_23 : f32 to vector<8x1xf32>
    %57 = arith.mulf %53, %56 : vector<8x1xf32>
    %58 = arith.mulf %55, %55 : vector<8x1xf32>
    %59 = arith.subf %57, %58 : vector<8x1xf32>
    %cst_24 = arith.constant 9.99999974E-6 : f32
    %60 = vector.broadcast %cst_24 : f32 to vector<8x1xf32>
    %61 = arith.addf %59, %60 : vector<8x1xf32>
    %62 = math.rsqrt %61 : vector<8x1xf32>
    %63 = arith.mulf %0, %62 : vector<8x1xf32>
    %64 = arith.mulf %55, %63 : vector<8x1xf32>
    %65 = arith.subf %1, %64 : vector<8x1xf32>
    %66 = vector.broadcast %63 : vector<8x1xf32> to vector<8x512xf32>
    %67 = arith.mulf %48, %66 : vector<8x512xf32>
    %68 = vector.broadcast %65 : vector<8x1xf32> to vector<8x512xf32>
    %69 = arith.addf %67, %68 : vector<8x512xf32>
    %cst_25 = arith.constant 0.000000e+00 : f32
    %70 = vector.broadcast %cst_25 : f32 to vector<8x512xf32>
    %71 = arith.maximumf %69, %70 : vector<8x512xf32>
    %c0_26 = arith.constant 0 : index
    %c0_27 = arith.constant 0 : index
    %72 = vector.load %arg2[%c0_26, %c0_27] : memref<8x72xbf16, #tpu.memory_space<vmem>>, vector<8x72xbf16>
    %c17_i32_28 = arith.constant 17 : i32
    %73 = tpu.dynamic_rotate %71 by %c17_i32_28 dim 1 : vector<8x512xf32>, i32 -> vector<8x512xf32>
    %c0_29 = arith.constant 0 : index
    %c0_30 = arith.constant 0 : index
    %74 = vector.load %arg4[%c0_29, %c0_30] : memref<8x512xf32, #tpu.memory_space<vmem>>, vector<1x512xf32>
    %75 = vector.broadcast %74 : vector<1x512xf32> to vector<8x512xf32>
    %76 = arith.mulf %73, %75 : vector<8x512xf32>
    %77 = arith.truncf %76 : vector<8x512xf32> to vector<8x512xbf16>
    %c16_i32_31 = arith.constant 16 : i32
    %78 = tpu.dynamic_rotate %71 by %c16_i32_31 dim 1 : vector<8x512xf32>, i32 -> vector<8x512xf32>
    %c1_32 = arith.constant 1 : index
    %c0_33 = arith.constant 0 : index
    %79 = vector.load %arg4[%c1_32, %c0_33] : memref<8x512xf32, #tpu.memory_space<vmem>>, vector<1x512xf32>
    %80 = vector.broadcast %79 : vector<1x512xf32> to vector<8x512xf32>
    %81 = arith.mulf %78, %80 : vector<8x512xf32>
    %82 = arith.truncf %81 : vector<8x512xf32> to vector<8x512xbf16>
    %c15_i32_34 = arith.constant 15 : i32
    %83 = tpu.dynamic_rotate %71 by %c15_i32_34 dim 1 : vector<8x512xf32>, i32 -> vector<8x512xf32>
    %c2_35 = arith.constant 2 : index
    %c0_36 = arith.constant 0 : index
    %84 = vector.load %arg4[%c2_35, %c0_36] : memref<8x512xf32, #tpu.memory_space<vmem>>, vector<1x512xf32>
    %85 = vector.broadcast %84 : vector<1x512xf32> to vector<8x512xf32>
    %86 = arith.mulf %83, %85 : vector<8x512xf32>
    %87 = arith.truncf %86 : vector<8x512xf32> to vector<8x512xbf16>
    %c1_i32_37 = arith.constant 1 : i32
    %88 = tpu.dynamic_rotate %71 by %c1_i32_37 dim 1 : vector<8x512xf32>, i32 -> vector<8x512xf32>
    %c3_38 = arith.constant 3 : index
    %c0_39 = arith.constant 0 : index
    %89 = vector.load %arg4[%c3_38, %c0_39] : memref<8x512xf32, #tpu.memory_space<vmem>>, vector<1x512xf32>
    %90 = vector.broadcast %89 : vector<1x512xf32> to vector<8x512xf32>
    %91 = arith.mulf %88, %90 : vector<8x512xf32>
    %92 = arith.truncf %91 : vector<8x512xf32> to vector<8x512xbf16>
    %93 = arith.truncf %71 : vector<8x512xf32> to vector<8x512xbf16>
    %c511_i32_40 = arith.constant 511 : i32
    %94 = tpu.dynamic_rotate %71 by %c511_i32_40 dim 1 : vector<8x512xf32>, i32 -> vector<8x512xf32>
    %c4_41 = arith.constant 4 : index
    %c0_42 = arith.constant 0 : index
    %95 = vector.load %arg4[%c4_41, %c0_42] : memref<8x512xf32, #tpu.memory_space<vmem>>, vector<1x512xf32>
    %96 = vector.broadcast %95 : vector<1x512xf32> to vector<8x512xf32>
    %97 = arith.mulf %94, %96 : vector<8x512xf32>
    %98 = arith.truncf %97 : vector<8x512xf32> to vector<8x512xbf16>
    %c497_i32_43 = arith.constant 497 : i32
    %99 = tpu.dynamic_rotate %71 by %c497_i32_43 dim 1 : vector<8x512xf32>, i32 -> vector<8x512xf32>
    %c5_44 = arith.constant 5 : index
    %c0_45 = arith.constant 0 : index
    %100 = vector.load %arg4[%c5_44, %c0_45] : memref<8x512xf32, #tpu.memory_space<vmem>>, vector<1x512xf32>
    %101 = vector.broadcast %100 : vector<1x512xf32> to vector<8x512xf32>
    %102 = arith.mulf %99, %101 : vector<8x512xf32>
    %103 = arith.truncf %102 : vector<8x512xf32> to vector<8x512xbf16>
    %c496_i32_46 = arith.constant 496 : i32
    %104 = tpu.dynamic_rotate %71 by %c496_i32_46 dim 1 : vector<8x512xf32>, i32 -> vector<8x512xf32>
    %c6_47 = arith.constant 6 : index
    %c0_48 = arith.constant 0 : index
    %105 = vector.load %arg4[%c6_47, %c0_48] : memref<8x512xf32, #tpu.memory_space<vmem>>, vector<1x512xf32>
    %106 = vector.broadcast %105 : vector<1x512xf32> to vector<8x512xf32>
    %107 = arith.mulf %104, %106 : vector<8x512xf32>
    %108 = arith.truncf %107 : vector<8x512xf32> to vector<8x512xbf16>
    %c495_i32_49 = arith.constant 495 : i32
    %109 = tpu.dynamic_rotate %71 by %c495_i32_49 dim 1 : vector<8x512xf32>, i32 -> vector<8x512xf32>
    %c7_50 = arith.constant 7 : index
    %c0_51 = arith.constant 0 : index
    %110 = vector.load %arg4[%c7_50, %c0_51] : memref<8x512xf32, #tpu.memory_space<vmem>>, vector<1x512xf32>
    %111 = vector.broadcast %110 : vector<1x512xf32> to vector<8x512xf32>
    %112 = arith.mulf %109, %111 : vector<8x512xf32>
    %113 = arith.truncf %112 : vector<8x512xf32> to vector<8x512xbf16>
    %114 = tpu.concatenate %77, %82, %87, %92, %93, %98, %103, %108, %113 in 0 : vector<8x512xbf16>, vector<8x512xbf16>, vector<8x512xbf16>, vector<8x512xbf16>, vector<8x512xbf16>, vector<8x512xbf16>, vector<8x512xbf16>, vector<8x512xbf16>, vector<8x512xbf16> -> vector<72x512xbf16>
    %cst_52 = arith.constant dense<0.000000e+00> : vector<8x512xf32>
    %115 = tpu.matmul %72, %114, %cst_52 {dimension_numbers = #tpu.dot_dimension_numbers<[1], [0], [0], [1], [0, 0, 1, 1], [], []>} : vector<8x72xbf16>, vector<72x512xbf16>, vector<8x512xf32> -> vector<8x512xf32>
    %cst_53 = arith.constant dense<0.000000e+00> : vector<8xf32>
    %116 = vector.multi_reduction <add>, %115, %cst_53 [1] : vector<8x512xf32> to vector<8xf32>
    %117 = vector.shape_cast %116 : vector<8xf32> to vector<8x1xf32>
    %118 = arith.mulf %115, %115 : vector<8x512xf32>
    %cst_54 = arith.constant dense<0.000000e+00> : vector<8xf32>
    %119 = vector.multi_reduction <add>, %118, %cst_54 [1] : vector<8x512xf32> to vector<8xf32>
    %120 = vector.shape_cast %119 : vector<8xf32> to vector<8x1xf32>
    %cst_55 = arith.constant 0.001953125 : f32
    %121 = vector.broadcast %cst_55 : f32 to vector<8x1xf32>
    %122 = arith.mulf %117, %121 : vector<8x1xf32>
    %cst_56 = arith.constant 0.001953125 : f32
    %123 = vector.broadcast %cst_56 : f32 to vector<8x1xf32>
    %124 = arith.mulf %120, %123 : vector<8x1xf32>
    %125 = arith.mulf %122, %122 : vector<8x1xf32>
    %126 = arith.subf %124, %125 : vector<8x1xf32>
    %cst_57 = arith.constant 9.99999974E-6 : f32
    %127 = vector.broadcast %cst_57 : f32 to vector<8x1xf32>
    %128 = arith.addf %126, %127 : vector<8x1xf32>
    %129 = math.rsqrt %128 : vector<8x1xf32>
    %130 = arith.mulf %2, %129 : vector<8x1xf32>
    %131 = arith.mulf %122, %130 : vector<8x1xf32>
    %132 = arith.subf %3, %131 : vector<8x1xf32>
    %133 = vector.broadcast %130 : vector<8x1xf32> to vector<8x512xf32>
    %134 = arith.mulf %115, %133 : vector<8x512xf32>
    %135 = vector.broadcast %132 : vector<8x1xf32> to vector<8x512xf32>
    %136 = arith.addf %134, %135 : vector<8x512xf32>
    %cst_58 = arith.constant 0.000000e+00 : f32
    %137 = vector.broadcast %cst_58 : f32 to vector<8x512xf32>
    %138 = arith.maximumf %136, %137 : vector<8x512xf32>
    %c0_59 = arith.constant 0 : index
    %c0_60 = arith.constant 0 : index
    %139 = vector.load %arg5[%c0_59, %c0_60] : memref<8x512xf32, #tpu.memory_space<vmem>>, vector<8x512xf32>
    tpu.vector_store %arg5[%c0_59, %c0_60], %138 {strides = array<i32>} : memref<8x512xf32, #tpu.memory_space<vmem>>, vector<8x512xf32>,
    return
  }
}

</mosaic_0001>

<bundles_post_ra>
// kernel: tpu_custom_call.1
= control target key start
LH: loop header
LB: loop body
LE: loop exit
PB: predicated region body
PF: predicated region fallthrough
CT: control target
= control target key end

     0   :  { %10 = vsyncpa [#allocation3], 0  ;;  %s1802_s0 = inlined_call_operand.hbm [shape: f32[8,512], index: 0, kind: input, shape index: {}]   ;;  %s1803_s1 = inlined_call_operand.vmem [shape: bf16[8,72], index: 1, kind: input, shape index: {}]   ;;  %s1804_s2 = inlined_call_operand.vmem [shape: bf16[8,72], index: 2, kind: input, shape index: {}]   ;;  %s1805_s3 = inlined_call_operand.vmem [shape: f32[8,4], index: 3, kind: input, shape index: {}]   ;;  %s1806_s4 = inlined_call_operand.hbm [shape: f32[8,512], index: 4, kind: input, shape index: {}]   ;;  %s1807_s5 = inlined_call_operand.hbm [shape: f32[8,512], index: 5, kind: output, shape index: {}]  }
   0x1   :  { %11 = vsyncpa [#allocation6], 0 }
   0x2   :  { %12 = vsyncpa [#allocation4], 0  ;;  %s1183_s18 = smov [#allocation2]   ;;  %s1184_s20 = smov [#allocation5]  }
   0x3   :  { %s19_s19 = sshll.u32 %s1183_s18, 4  ;;  %s35_s21 = sshll.u32 %s1184_s20, 4  ;;  %s20_s19 = int_to_ptr.vmem [resolvable:$true] %s19_s19  ;;  %s36_s21 = int_to_ptr.vmem [resolvable:$true] %s35_s21 }
   0x4   :  { %s1111_s24 = scalar_lea.hbm %s1802_s0, 512 }
   0x5   :  { %p1112_p0 = scmp.ne.s32.totalorder %s1802_s0, %s1111_s24  ;;  %p1115_p1 = scmp.lt.u32.totalorder %s1111_s24, %s1802_s0 }
   0x7   :  { %p1117_p2 = pnand %p1115_p1, %p1112_p0 }
   0x9   :  { %1120 = shalt.err (!%p1117_p2)
}
   0xa   :  { %s1121_s29 = scalar_lea.vmem %s20_s19, 512  ;;  %p1126_p4 = scmp.lt.s32.totalorder %s20_s19, %s20_s19 }
   0xb   :  { %p1122_p3 = scmp.ne.s32.totalorder %s20_s19, %s1121_s29  ;;  %p1127_p5 = scmp.lt.s32.totalorder %s1121_s29, %s1121_s29 }
   0xd   :  { %p1128_p6 = por %p1127_p5, %p1126_p4 }
   0xf   :  { %p1129_p7 = pnand %p1128_p6, %p1122_p3 }
  0x11   :  { %1132 = shalt.err (!%p1129_p7)
}
  0x12   :  { %22 = dma.hbm_to_vmem [thread:$0]  %s1802_s0, 512, %s20_s19, [#allocation3]  }
  0x13   :  { %s1133_s9 = scalar_lea.hbm %s1806_s4, 512 }
  0x14   :  { %p1134_p8 = scmp.ne.s32.totalorder %s1806_s4, %s1133_s9  ;;  %p1137_p9 = scmp.lt.u32.totalorder %s1133_s9, %s1806_s4 }
  0x16   :  { %p1139_p10 = pnand %p1137_p9, %p1134_p8 }
  0x18   :  { %1142 = shalt.err (!%p1139_p10)
}
  0x19   :  { %s1143_s14 = scalar_lea.vmem %s36_s21, 512  ;;  %p1148_p12 = scmp.lt.s32.totalorder %s36_s21, %s36_s21 }
  0x1a   :  { %p1144_p11 = scmp.ne.s32.totalorder %s36_s21, %s1143_s14  ;;  %p1149_p13 = scmp.lt.s32.totalorder %s1143_s14, %s1143_s14 }
  0x1c   :  { %p1150_p0 = por %p1149_p13, %p1148_p12 }
  0x1e   :  { %p1151_p1 = pnand %p1150_p0, %p1144_p11 }
  0x20   :  { %1154 = shalt.err (!%p1151_p1)
}
  0x21   :  { %38 = dma.hbm_to_vmem [thread:$0]  %s1806_s4, 512, %s36_s21, [#allocation6]  }
  0x22   :  { %1177 = dma.done.wait [#allocation3], 512  }
  0x23   :  { %1178 = vsyncadd [#allocation3], 4294966784 }
  0x24   :  { %1179 = dma.done.wait [#allocation6], 512  }
  0x25   :  { %1180 = vsyncadd [#allocation6], 4294966784  ;;  %v1252_v0 = vld [vmem:[#allocation2 + $0x18] sm:$0xff]  ;;  %v1254_v1 = vld [vmem:[#allocation2] sm:$0xff]  ;;  %s1185_s16 = smov 16   ;;  %s1186_s17 = smov 17   ;;  %v60_v5 = vlaneseq }
  0x26   :  { %103 = vrot.lane.b32.xlu1 %v1252_v0, %s1185_s16  ;;  %97 = vrot.lane.b32.xlu0 %v1254_v1, %s1185_s16  ;;  %v1260_v2 = vld [vmem:[#allocation2 + $0x8] sm:$0xff]  ;;  %v1270_v3 = vld [vmem:[#allocation2 + $0x10] sm:$0xff]  ;;  %s1187_s4 = smov 1   ;;  %s1188_s18 = smov 15   ;;  %v1192_v4 = vmov 0   ;;  %vm441_vm2 = vcmask 1043456  }
  0x27   :  { %s1189_s19 = smov 127   ;;  %s1190_s20 = smov 112   ;;  %554 = vmatprep.mubr.bf16.mxu0 %v1192_v4  ;;  %595 = vmatprep.mubr.bf16.mxu1 %v1192_v4  ;;  %v70_v6 = vshrl.u32 %v60_v5, 7  ;;  %v1327_v7 = vand.u32 127, %v60_v5  ;;  %vm506_vm9 = vcmask 588800  }
  0x28   :  { %s1191_s21 = smov 113   ;;  %1103 = vset.pattern.permute.xlu1 %v1192_v4  ;;  %s1193_s22 = smov 111   ;;  %v111_v9 = vld [vmem:[#allocation5 + $0x1] ss:$8 sm:$0xf] }
  0x29   :  { %v1329_v8 = vsub.s32 0, %v70_v6  ;;  %vm105_vm0 = vcmp.lt.s32.totalorder %v1327_v7, 16  ;;  %v1332_v10 = vsub.s32 1, %v70_v6  ;;  %v67_v16 = vld [vmem:[#allocation5] ss:$8 sm:$0xf] }
  0x2a   :  { %52 = vrot.lane.b32.xlu1 %v1254_v1, %s1186_s17  ;;  %99 = vrot.lane.b32.xlu0 %v1260_v2, %s1185_s16  ;;  %vm62_vm1 = vcmp.lt.s32.totalorder %v1327_v7, 17  ;;  %v1346_v21 = vsub.s32 2, %v70_v6  ;;  %v1355_v25 = vsub.s32 3, %v70_v6  ;;  %vm193_vm3 = vcmp.lt.s32.totalorder %v1327_v7, 1 }
  0x2b   :  { %v1335_v12 = vrot.slane %v111_v9, %v1329_v8  ;;  %v1340_v15 = vrot.slane %v111_v9, %v1332_v10  ;;  %v1350_v23 = vrot.slane %v67_v16, %v1329_v8  ;;  %v1353_v24 = vrot.slane %v67_v16, %v1332_v10  ;;  %v199_v46 = vld [vmem:[#allocation5 + $0x3] ss:$8 sm:$0xf]  ;;  %v155_v62 = vld [vmem:[#allocation5 + $0x2] ss:$8 sm:$0xf] }
  0x2c   :  { %v1364_v34 = vrot.slane %v111_v9, %v1346_v21  ;;  %v1367_v35 = vrot.slane %v111_v9, %v1355_v25  ;;  %v1370_v36 = vrot.slane %v67_v16, %v1346_v21  ;;  %v1377_v45 = vrot.slane %v67_v16, %v1355_v25 }
  0x2d   :  { %v1385_v54 = vrot.slane %v199_v46, %v1332_v10  ;;  %v1396_v61 = vrot.slane %v199_v46, %v1329_v8  ;;  %vm149_vm4 = vcmp.lt.s32.totalorder %v1327_v7, 15  ;;  %vm241_vm5 = vcmp.lt.s32.totalorder %v1327_v7, 127 }
  0x2e   :  { %58 = vrot.lane.b32.xlu1 %v1252_v0, %s1186_s17  ;;  %54 = vrot.lane.b32.xlu0 %v1260_v2, %s1186_s17  ;;  %vm329_vm6 = vcmp.lt.s32.totalorder %v1327_v7, 112  ;;  %vm285_vm7 = vcmp.lt.s32.totalorder %v1327_v7, 113  ;;  %vm373_vm8 = vcmp.lt.s32.totalorder %v1327_v7, 111 }
  0x32   :  { %185 = vrot.lane.b32.xlu1 %v1254_v1, %s1187_s4  ;;  %101 = vrot.lane.b32.xlu0 %v1270_v3, %s1185_s16 }
  0x36   :  { %56 = vrot.lane.b32.xlu1 %v1270_v3, %s1186_s17  ;;  %187 = vrot.lane.b32.xlu0 %v1260_v2, %s1187_s4 }
  0x3a   :  { %141 = vrot.lane.b32.xlu1 %v1254_v1, %s1188_s18  ;;  %191 = vrot.lane.b32.xlu0 %v1252_v0, %s1187_s4 }
  0x3e   :  { %147 = vrot.lane.b32.xlu1 %v1252_v0, %s1188_s18  ;;  %143 = vrot.lane.b32.xlu0 %v1260_v2, %s1188_s18 }
  0x42   :  { %235 = vrot.lane.b32.xlu1 %v1260_v2, %s1189_s19  ;;  %189 = vrot.lane.b32.xlu0 %v1270_v3, %s1187_s4 }
  0x46   :  { %145 = vrot.lane.b32.xlu1 %v1270_v3, %s1188_s18  ;;  %237 = vrot.lane.b32.xlu0 %v1270_v3, %s1189_s19 }
  0x4a   :  { %239 = vrot.lane.b32.xlu1 %v1252_v0, %s1189_s19  ;;  %233 = vrot.lane.b32.xlu0 %v1254_v1, %s1189_s19 }
  0x4e   :  { %325 = vrot.lane.b32.xlu1 %v1270_v3, %s1190_s20  ;;  %323 = vrot.lane.b32.xlu0 %v1260_v2, %s1190_s20 }
  0x52   :  { %279 = vrot.lane.b32.xlu1 %v1260_v2, %s1191_s21  ;;  %321 = vrot.lane.b32.xlu0 %v1254_v1, %s1190_s20 }
  0x56   :  { %277 = vrot.lane.b32.xlu1 %v1254_v1, %s1191_s21  ;;  %281 = vrot.lane.b32.xlu0 %v1270_v3, %s1191_s21 }
  0x5a   :  { %283 = vrot.lane.b32.xlu1 %v1252_v0, %s1191_s21  ;;  %327 = vrot.lane.b32.xlu0 %v1252_v0, %s1190_s20 }
  0x5e   :  { %367 = vrot.lane.b32.xlu1 %v1260_v2, %s1193_s22  ;;  %365 = vrot.lane.b32.xlu0 %v1254_v1, %s1193_s22 }
  0x62   :  { %371 = vrot.lane.b32.xlu1 %v1252_v0, %s1193_s22  ;;  %369 = vrot.lane.b32.xlu0 %v1270_v3, %s1193_s22 }
  0x98   :  { %v104_v11 = vpop.permute.xlu1 %103  ;;  %v98_v13 = vpop.permute.xlu0 %97 }
  0x99   :  { %v109_v14 = vsel %vm105_vm0, %v104_v11, %v98_v13 }
  0x9a   :  { %v133_v17 = vmul.f32 %v1335_v12, %v109_v14 }
  0x9c   :  { %v53_v18 = vpop.permute.xlu1 %52  ;;  %v100_v19 = vpop.permute.xlu0 %99  ;;  %v137_v26 = vpack.c.bf16 %v133_v17, %v133_v17  ;;  %v1403_v17 = vrot.slane %v155_v62, %v1329_v8 }
  0x9d   :  { %v108_v20 = vsel %vm105_vm0, %v98_v13, %v100_v19 }
  0x9e   :  { %v134_v22 = vmul.f32 %v1340_v15, %v108_v20  ;;  %v413_v37 = vrot.slane %v137_v26, 4 }
  0xa0   :  { %v138_v27 = vpack.c.bf16 %v134_v22, %v134_v22  ;;  %v59_v28 = vpop.permute.xlu1 %58  ;;  %v55_v29 = vpop.permute.xlu0 %54  ;;  %v1409_v22 = vrot.slane %v155_v62, %v1332_v10 }
  0xa1   :  { %v66_v30 = vsel %vm62_vm1, %v59_v28, %v53_v18  ;;  %v65_v31 = vsel %vm62_vm1, %v53_v18, %v55_v29 }
  0xa2   :  { %v89_v32 = vmul.f32 %v1350_v23, %v66_v30  ;;  %v90_v33 = vmul.f32 %v1353_v24, %v65_v31  ;;  %v414_v38 = vrot.slane %v138_v27, 4 }
  0xa4   :  { %v93_v39 = vpack.c.bf16 %v89_v32, %v89_v32  ;;  %v94_v40 = vpack.c.bf16 %v90_v33, %v90_v33  ;;  %v186_v41 = vpop.permute.xlu1 %185  ;;  %v102_v42 = vpop.permute.xlu0 %101 }
  0xa5   :  { %v106_v43 = vsel %vm105_vm0, %v102_v42, %v104_v11  ;;  %v107_v44 = vsel %vm105_vm0, %v100_v19, %v102_v42 }
  0xa6   :  { %v135_v47 = vmul.f32 %v1364_v34, %v107_v44  ;;  %v136_v48 = vmul.f32 %v1367_v35, %v106_v43  ;;  %v448_v49 = vsel %vm441_vm2, %v94_v40, %v414_v38  ;;  %v444_v50 = vsel %vm441_vm2, %v93_v39, %v413_v37 }
  0xa7   :  { %522 = vmatprep.subr.bf16.mxu0 %v448_v49  ;;  %v1418_v37 = vrot.slane %v199_v46, %v1346_v21  ;;  %v1421_v38 = vrot.slane %v199_v46, %v1355_v25  ;;  %v1424_v39 = vrot.slane %v155_v62, %v1346_v21 }
  0xa8   :  { %v139_v51 = vpack.c.bf16 %v135_v47, %v135_v47  ;;  %v140_v52 = vpack.c.bf16 %v136_v48, %v136_v48  ;;  %v57_v53 = vpop.permute.xlu1 %56  ;;  %523 = vmatpush1.bf16.msra.mxu0 %v444_v50  ;;  %v188_v55 = vpop.permute.xlu0 %187  ;;  %v247_v48 = vld [vmem:[#allocation5 + $0x4] ss:$8 sm:$0xf] }
  0xa9   :  { %v63_v56 = vsel %vm62_vm1, %v57_v53, %v59_v28  ;;  %v64_v57 = vsel %vm62_vm1, %v55_v29, %v57_v53  ;;  %v196_v58 = vsel %vm193_vm3, %v186_v41, %v188_v55 }
  0xaa   :  { %v91_v59 = vmul.f32 %v1370_v36, %v64_v57  ;;  %v92_v60 = vmul.f32 %v1377_v45, %v63_v56  ;;  %v415_v63 = vrot.slane %v139_v51, 4  ;;  %v416_v5 = vrot.slane %v140_v52, 4 }
  0xab   :  { %v222_v11 = vmul.f32 %v1385_v54, %v196_v58  ;;  %v1431_v51 = vrot.slane %v155_v62, %v1355_v25  ;;  %v1439_v57 = vrot.slane %v247_v48, %v1332_v10  ;;  %v1441_v62 = vld [vmem:[#allocation5 + $0x6] ss:$8 sm:$0xf] }
  0xac   :  { %v95_v6 = vpack.c.bf16 %v91_v59, %v91_v59  ;;  %v96_v9 = vpack.c.bf16 %v92_v60, %v92_v60  ;;  %v142_v13 = vpop.permute.xlu1 %141  ;;  %v192_v14 = vpop.permute.xlu0 %191 }
  0xad   :  { %v197_v16 = vsel %vm193_vm3, %v192_v14, %v186_v41  ;;  %v226_v26 = vpack.c.bf16 %v222_v11, %v222_v11 }
  0xae   :  { %v221_v18 = vmul.f32 %v1396_v61, %v197_v16  ;;  %v456_v19 = vsel %vm441_vm2, %v96_v9, %v416_v5  ;;  %v452_v20 = vsel %vm441_vm2, %v95_v6, %v415_v63  ;;  %v1450_v9 = vrot.slane %v247_v48, %v1346_v21 }
  0xaf   :  { %563 = vmatprep.subr.bf16.mxu1 %v456_v19  ;;  %v422_v40 = vrot.slane %v226_v26, 4  ;;  %v1458_v16 = vrot.slane %v247_v48, %v1355_v25  ;;  %v1464_v19 = vrot.slane %v1441_v62, %v1332_v10 }
  0xb0   :  { %v225_v27 = vpack.c.bf16 %v221_v18, %v221_v18  ;;  %v148_v28 = vpop.permute.xlu1 %147  ;;  %564 = vmatpush1.bf16.msra.mxu1 %v452_v20  ;;  %v144_v29 = vpop.permute.xlu0 %143  ;;  %v230_v20 = vpack.c.bf16 %v1260_v2, %v1260_v2 }
  0xb1   :  { %v153_v30 = vsel %vm149_vm4, %v148_v28, %v142_v13  ;;  %v152_v31 = vsel %vm149_vm4, %v142_v13, %v144_v29 }
  0xb2   :  { %v177_v32 = vmul.f32 %v1403_v17, %v153_v30  ;;  %v178_v33 = vmul.f32 %v1409_v22, %v152_v31  ;;  %v421_v41 = vrot.slane %v225_v27, 4 }
  0xb4   :  { %v181_v42 = vpack.c.bf16 %v177_v32, %v177_v32  ;;  %v182_v43 = vpack.c.bf16 %v178_v33, %v178_v33  ;;  %v236_v44 = vpop.permute.xlu1 %235  ;;  %v190_v47 = vpop.permute.xlu0 %189 }
  0xb5   :  { %v194_v49 = vsel %vm193_vm3, %v190_v47, %v192_v14  ;;  %v195_v50 = vsel %vm193_vm3, %v188_v55, %v190_v47  ;;  %v1455_v14 = vrot.slane %v247_v48, %v1329_v8 }
  0xb6   :  { %v223_v46 = vmul.f32 %v1418_v37, %v195_v50  ;;  %v224_v52 = vmul.f32 %v1421_v38, %v194_v49  ;;  %v464_v53 = vsel %vm441_vm2, %v182_v43, %v422_v40  ;;  %v460_v56 = vsel %vm441_vm2, %v181_v42, %v421_v41 }
  0xb7   :  { %524 = vmatprep.subr.bf16.mxu0 %v464_v53  ;;  %v229_v50 = vpack.c.bf16 %v1254_v1, %v1254_v1 }
  0xb8   :  { %v227_v58 = vpack.c.bf16 %v223_v46, %v223_v46  ;;  %v228_v59 = vpack.c.bf16 %v224_v52, %v224_v52  ;;  %v146_v55 = vpop.permute.xlu1 %145  ;;  %525 = vmatpush1.bf16.msra.mxu0 %v460_v56  ;;  %v238_v60 = vpop.permute.xlu0 %237 }
  0xb9   :  { %v150_v63 = vsel %vm149_vm4, %v146_v55, %v148_v28  ;;  %v151_v5 = vsel %vm149_vm4, %v144_v29, %v146_v55  ;;  %v243_v6 = vsel %vm241_vm5, %v236_v44, %v238_v60 }
  0xba   :  { %v179_v11 = vmul.f32 %v1424_v39, %v151_v5  ;;  %v180_v13 = vmul.f32 %v1431_v51, %v150_v63  ;;  %v270_v18 = vmul.f32 %v1439_v57, %v243_v6  ;;  %v423_v26 = vrot.slane %v227_v58, 4  ;;  %v291_v6 = vld [vmem:[#allocation5 + $0x5] ss:$8 sm:$0xf] }
  0xbb   :  { %v424_v27 = vrot.slane %v228_v59, 4  ;;  %v231_v59 = vpack.c.bf16 %v1270_v3, %v1270_v3 }
  0xbc   :  { %v183_v28 = vpack.c.bf16 %v179_v11, %v179_v11  ;;  %v184_v29 = vpack.c.bf16 %v180_v13, %v180_v13  ;;  %v240_v30 = vpop.permute.xlu1 %239  ;;  %v234_v31 = vpop.permute.xlu0 %233  ;;  %v274_v32 = vpack.c.bf16 %v270_v18, %v270_v18 }
  0xbd   :  { %v242_v33 = vsel %vm241_vm5, %v238_v60, %v240_v30  ;;  %v244_v40 = vsel %vm241_vm5, %v234_v31, %v236_v44  ;;  %v245_v41 = vsel %vm241_vm5, %v240_v30, %v234_v31  ;;  %v232_v44 = vpack.c.bf16 %v1252_v0, %v1252_v0 }
  0xbe   :  { %v271_v42 = vmul.f32 %v1450_v9, %v242_v33  ;;  %v269_v2 = vmul.f32 %v1455_v14, %v244_v40  ;;  %v272_v43 = vmul.f32 %v1458_v16, %v245_v41  ;;  %v472_v47 = vsel %vm441_vm2, %v184_v29, %v424_v27  ;;  %v379_v41 = vld [vmem:[#allocation5 + $0x7] ss:$8 sm:$0xf] }
  0xbf   :  { %v430_v48 = vrot.slane %v274_v32, 4  ;;  %565 = vmatprep.subr.bf16.mxu1 %v472_v47  ;;  %v468_v49 = vsel %vm441_vm2, %v183_v28, %v423_v26  ;;  %v1490_v0 = vrot.slane %v1441_v62, %v1329_v8  ;;  %v1501_v29 = vrot.slane %v291_v6, %v1329_v8 }
  0xc0   :  { %v275_v46 = vpack.c.bf16 %v271_v42, %v271_v42  ;;  %v273_v52 = vpack.c.bf16 %v269_v2, %v269_v2  ;;  %v276_v53 = vpack.c.bf16 %v272_v43, %v272_v43  ;;  %v326_v56 = vpop.permute.xlu1 %325  ;;  %566 = vmatpush1.bf16.msra.mxu1 %v468_v49  ;;  %v324_v58 = vpop.permute.xlu0 %323  ;;  %v1504_v30 = vrot.slane %v291_v6, %v1332_v10 }
  0xc1   :  { %v331_v55 = vsel %vm329_vm6, %v324_v58, %v326_v56  ;;  %v480_v60 = vsel %vm441_vm2, %v230_v20, %v430_v48  ;;  %v1511_v43 = vrot.slane %v291_v6, %v1346_v21  ;;  %v1514_v47 = vrot.slane %v291_v6, %v1355_v25 }
  0xc2   :  { %v431_v63 = vrot.slane %v275_v46, 4  ;;  %v429_v5 = vrot.slane %v273_v52, 4  ;;  %v432_v1 = vrot.slane %v276_v53, 4  ;;  %526 = vmatprep.subr.bf16.mxu0 %v480_v60  ;;  %v358_v11 = vmul.f32 %v1464_v19, %v331_v55 }
  0xc3   :  { %v1528_v46 = vrot.slane %v379_v41, %v1329_v8 }
  0xc4   :  { %v280_v13 = vpop.permute.xlu1 %279  ;;  %v322_v18 = vpop.permute.xlu0 %321  ;;  %v476_v3 = vsel %vm441_vm2, %v229_v50, %v429_v5  ;;  %v488_v26 = vsel %vm441_vm2, %v232_v44, %v432_v1  ;;  %v484_v27 = vsel %vm441_vm2, %v231_v59, %v431_v63  ;;  %v362_v31 = vpack.c.bf16 %v358_v11, %v358_v11 }
  0xc5   :  { %v332_v20 = vsel %vm329_vm6, %v322_v18, %v324_v58  ;;  %527 = vmatpush1.bf16.msra.mxu0 %v476_v3  ;;  %567 = vmatprep.subr.bf16.mxu1 %v488_v26  ;;  %v1520_v50 = vrot.slane %v1441_v62, %v1346_v21  ;;  %v1524_v44 = vrot.slane %v1441_v62, %v1355_v25 }
  0xc6   :  { %v357_v28 = vmul.f32 %v1490_v0, %v332_v20  ;;  %568 = vmatpush1.bf16.msra.mxu1 %v484_v27  ;;  %v438_v52 = vrot.slane %v362_v31, 4  ;;  %v1545_v31 = vrot.slane %v379_v41, %v1355_v25 }
  0xc8   :  { %v361_v32 = vpack.c.bf16 %v357_v28, %v357_v28  ;;  %v278_v33 = vpop.permute.xlu1 %277  ;;  %v282_v40 = vpop.permute.xlu0 %281 }
  0xc9   :  { %v288_v42 = vsel %vm285_vm7, %v278_v33, %v280_v13  ;;  %v287_v2 = vsel %vm285_vm7, %v280_v13, %v282_v40 }
  0xca   :  { %v313_v48 = vmul.f32 %v1501_v29, %v288_v42  ;;  %v314_v49 = vmul.f32 %v1504_v30, %v287_v2  ;;  %v437_v53 = vrot.slane %v361_v32, 4 }
  0xcc   :  { %v317_v58 = vpack.c.bf16 %v313_v48, %v313_v48  ;;  %v318_v59 = vpack.c.bf16 %v314_v49, %v314_v49  ;;  %v284_v55 = vpop.permute.xlu1 %283  ;;  %v328_v60 = vpop.permute.xlu0 %327 }
  0xcd   :  { %v286_v63 = vsel %vm285_vm7, %v282_v40, %v284_v55  ;;  %v289_v5 = vsel %vm285_vm7, %v284_v55, %v278_v33  ;;  %v330_v62 = vsel %vm329_vm6, %v326_v56, %v328_v60  ;;  %v333_v1 = vsel %vm329_vm6, %v328_v60, %v322_v18 }
  0xce   :  { %v315_v8 = vmul.f32 %v1511_v43, %v286_v63  ;;  %v316_v6 = vmul.f32 %v1514_v47, %v289_v5  ;;  %v359_v11 = vmul.f32 %v1520_v50, %v330_v62  ;;  %v360_v13 = vmul.f32 %v1524_v44, %v333_v1 }
  0xcf   :  { %v496_v3 = vsel %vm441_vm2, %v318_v59, %v438_v52  ;;  %v492_v26 = vsel %vm441_vm2, %v317_v58, %v437_v53  ;;  %v1550_v33 = vrot.slane %v379_v41, %v1332_v10  ;;  %v1553_v40 = vrot.slane %v379_v41, %v1346_v21 }
  0xd0   :  { %v363_v27 = vpack.c.bf16 %v359_v11, %v359_v11  ;;  %v364_v20 = vpack.c.bf16 %v360_v13, %v360_v13  ;;  %528 = vmatprep.subr.bf16.mxu0 %v496_v3  ;;  %v368_v28 = vpop.permute.xlu1 %367  ;;  %v366_v56 = vpop.permute.xlu0 %365  ;;  %v319_v18 = vpack.c.bf16 %v315_v8, %v315_v8  ;;  %v320_v42 = vpack.c.bf16 %v316_v6, %v316_v6  ;;  %v51_v11 = vld [vmem:[%s1803_s1] sm:$0xf] }
  0xd1   :  { %v376_v32 = vsel %vm373_vm8, %v366_v56, %v368_v28  ;;  %529 = vmatpush1.bf16.msra.mxu0 %v492_v26 }
  0xd2   :  { %v439_v2 = vrot.slane %v363_v27, 4  ;;  %v440_v48 = vrot.slane %v364_v20, 4  ;;  %v401_v49 = vmul.f32 %v1528_v46, %v376_v32 }
  0xd4   :  { %v372_v52 = vpop.permute.xlu1 %371  ;;  %v370_v53 = vpop.permute.xlu0 %369  ;;  %v504_v25 = vsel %vm441_vm2, %v320_v42, %v440_v48  ;;  %v500_v58 = vsel %vm441_vm2, %v319_v18, %v439_v2  ;;  %v405_v41 = vpack.c.bf16 %v401_v49, %v401_v49 }
  0xd5   :  { %v377_v59 = vsel %vm373_vm8, %v372_v52, %v366_v56  ;;  %v374_v10 = vsel %vm373_vm8, %v370_v53, %v372_v52  ;;  %v375_v21 = vsel %vm373_vm8, %v368_v28, %v370_v53  ;;  %569 = vmatprep.subr.bf16.mxu1 %v504_v25 }
  0xd6   :  { %v404_v55 = vmul.f32 %v1545_v31, %v377_v59  ;;  %v402_v60 = vmul.f32 %v1550_v33, %v375_v21  ;;  %v403_v63 = vmul.f32 %v1553_v40, %v374_v10  ;;  %570 = vmatpush1.bf16.msra.mxu1 %v500_v58  ;;  %v511_v8 = vsel %vm441_vm2, %v405_v41, 0 }
  0xd8   :  { %v408_v5 = vpack.c.bf16 %v404_v55, %v404_v55  ;;  %v406_v62 = vpack.c.bf16 %v402_v60, %v402_v60  ;;  %v407_v1 = vpack.c.bf16 %v403_v63, %v403_v63 }
  0xda   :  { %1080 = vmatprep.subr.msk.bf16.mxu0 %vm441_vm2, %v406_v62  ;;  %1082 = vmatprep.subr.msk.bf16.mxu1 %vm441_vm2, %v408_v5  ;;  %v517_v6 = vsel %vm441_vm2, %v407_v1, 0  ;;  %v1194_v5 = vmov 1   ;;  %v1581_v62 = vld [vmem:[%s1805_s3] sm:$0xff] }
  0xdb   :  { %531 = vmatpush1.bf16.msra.mxu0 %v511_v8  ;;  %572 = vmatpush1.bf16.msra.mxu1 %v517_v6 }
  0xdc   :  { %1104 = vset.pattern.permute.xlu0 %v1194_v5 }
  0xde   :  { %1081 = vmatmul.mubr.msk.bf16.vlgmr.msra.gmra.mrb[0].mxu0 %vm506_vm9, %v51_v11  ;;  %1083 = vmatmul.mubr.msk.bf16.vlgmr.msra.gmra.mrb[0].mxu1 %vm506_vm9, %v51_v11 }
  0xdf   :  { %961 = vmatprep.mubr.bf16.mxu0 %v1192_v4  ;;  %1002 = vmatprep.mubr.bf16.mxu1 %v1192_v4 }
 0x1b1   :  { %v556_v13 = vpop.f32.mrb[0].mxu0  ;;  %v597_v3 = vpop.f32.mrb[0].mxu1 }
 0x1b2   :  { %v609_v26 = vmul.f32 %v556_v13, %v556_v13  ;;  %v558_v27 = vpop.f32.mrb[1].mxu0  ;;  %v599_v20 = vpop.f32.mrb[1].mxu1  ;;  %v611_v28 = vmul.f32 %v597_v3, %v597_v3 }
 0x1b3   :  { %v604_v56 = vadd.f32 %v558_v27, %v556_v13  ;;  %v610_v18 = vmul.f32 %v558_v27, %v558_v27  ;;  %v560_v32 = vpop.f32.mrb[2].mxu0  ;;  %v601_v42 = vpop.f32.mrb[2].mxu1  ;;  %v612_v25 = vmul.f32 %v599_v20, %v599_v20 }
 0x1b4   :  { %v561_v2 = vpop.f32.mrb[3].mxu0  ;;  %v602_v48 = vpop.f32.mrb[3].mxu1 }
 0x1b5   :  { %v605_v49 = vadd.f32 %v604_v56, %v597_v3  ;;  %v613_v52 = vadd.f32 %v610_v18, %v609_v26 }
 0x1b7   :  { %v606_v53 = vadd.f32 %v605_v49, %v599_v20  ;;  %v614_v58 = vadd.f32 %v613_v52, %v611_v28 }
 0x1b9   :  { %607 = vadd.xlane.f32.xlu0 %v606_v53  ;;  %v615_v59 = vadd.f32 %v614_v58, %v612_v25 }
 0x1bb   :  { %616 = vadd.xlane.f32.xlu1 %v615_v59 }
 0x246   :  { %v608_v4 = vpop.xlane.xlu0 %607 }
 0x247   :  { %v618_v10 = vmul.f32 0.001953125, %v608_v4 }
 0x248   :  { %v617_v21 = vpop.xlane.xlu1 %616 }
 0x249   :  { %v620_v41 = vmul.f32 %v618_v10, %v618_v10  ;;  %v619_v55 = vmul.f32 0.001953125, %v617_v21 }
 0x24b   :  { %v621_v60 = vsub.f32 %v619_v55, %v620_v41 }
 0x24d   :  { %v622_v63 = vadd.f32 1e-05, %v621_v60 }
 0x24f   :  { %1107 = vrsqrt.f32 %v622_v63 }
 0x259   :  { %v1108_v1 = vpop.eup %1107 }
 0x25a   :  { %v624_v8 = vmul.f32 %v1108_v1, %v1581_v62 }
 0x25c   :  { %633 = vperm.xlu1 %1103, %v624_v8   ;;  %v625_v6 = vmul.f32 %v624_v8, %v618_v10 }
 0x25e   :  { %627 = vrot.lane.b32.xlu0 %v625_v6, %s1187_s4 }
 0x2d0   :  { %v628_v11 = vpop.permute.xlu0 %627 }
 0x2d1   :  { %v630_v26 = vsub.f32 %v1581_v62, %v628_v11 }
 0x2d3   :  { %642 = vperm.xlu0 %1104, %v630_v26  }
 0x2db   :  { %v634_v28 = vpop.permute.xlu1 %633 }
 0x2dc   :  { %v636_v56 = vmul.f32 %v634_v28, %v556_v13  ;;  %v639_v18 = vmul.f32 %v634_v28, %v599_v20  ;;  %v637_v42 = vmul.f32 %v634_v28, %v558_v27  ;;  %v638_v25 = vmul.f32 %v634_v28, %v597_v3 }
 0x352   :  { %v643_v32 = vpop.permute.xlu0 %642 }
 0x353   :  { %v645_v2 = vadd.f32 %v643_v32, %v636_v56  ;;  %v648_v48 = vadd.f32 %v643_v32, %v639_v18  ;;  %v646_v49 = vadd.f32 %v643_v32, %v637_v42  ;;  %v647_v58 = vadd.f32 %v643_v32, %v638_v25 }
 0x355   :  { %v1586_v52 = vmax.f32 %v645_v2, 0.0  ;;  %v1588_v53 = vmax.f32 %v648_v48, 0.0  ;;  %v1594_v59 = vmax.f32 %v646_v49, 0.0  ;;  %v1600_v13 = vmax.f32 %v647_v58, 0.0 }
 0x357   :  { %680 = vrot.lane.b32.xlu0 %v1588_v53, %s1185_s16  ;;  %674 = vrot.lane.b32.xlu1 %v1586_v52, %s1185_s16 }
 0x35b   :  { %656 = vrot.lane.b32.xlu0 %v1594_v59, %s1186_s17  ;;  %676 = vrot.lane.b32.xlu1 %v1594_v59, %s1185_s16 }
 0x35f   :  { %678 = vrot.lane.b32.xlu0 %v1600_v13, %s1185_s16  ;;  %654 = vrot.lane.b32.xlu1 %v1586_v52, %s1186_s17 }
 0x363   :  { %716 = vrot.lane.b32.xlu0 %v1594_v59, %s1187_s4  ;;  %660 = vrot.lane.b32.xlu1 %v1588_v53, %s1186_s17 }
 0x367   :  { %720 = vrot.lane.b32.xlu0 %v1588_v53, %s1187_s4  ;;  %714 = vrot.lane.b32.xlu1 %v1586_v52, %s1187_s4 }
 0x36b   :  { %696 = vrot.lane.b32.xlu0 %v1594_v59, %s1188_s18  ;;  %658 = vrot.lane.b32.xlu1 %v1600_v13, %s1186_s17 }
 0x36f   :  { %718 = vrot.lane.b32.xlu0 %v1600_v13, %s1187_s4  ;;  %694 = vrot.lane.b32.xlu1 %v1586_v52, %s1188_s18 }
 0x373   :  { %742 = vrot.lane.b32.xlu0 %v1600_v13, %s1189_s19  ;;  %700 = vrot.lane.b32.xlu1 %v1588_v53, %s1188_s18 }
 0x377   :  { %738 = vrot.lane.b32.xlu0 %v1586_v52, %s1189_s19  ;;  %740 = vrot.lane.b32.xlu1 %v1594_v59, %s1189_s19 }
 0x37b   :  { %780 = vrot.lane.b32.xlu0 %v1594_v59, %s1190_s20  ;;  %698 = vrot.lane.b32.xlu1 %v1600_v13, %s1188_s18 }
 0x37f   :  { %778 = vrot.lane.b32.xlu0 %v1586_v52, %s1190_s20  ;;  %744 = vrot.lane.b32.xlu1 %v1588_v53, %s1189_s19 }
 0x383   :  { %762 = vrot.lane.b32.xlu0 %v1600_v13, %s1191_s21  ;;  %782 = vrot.lane.b32.xlu1 %v1600_v13, %s1190_s20 }
 0x387   :  { %784 = vrot.lane.b32.xlu0 %v1588_v53, %s1190_s20  ;;  %760 = vrot.lane.b32.xlu1 %v1594_v59, %s1191_s21 }
 0x38b   :  { %798 = vrot.lane.b32.xlu0 %v1586_v52, %s1193_s22  ;;  %758 = vrot.lane.b32.xlu1 %v1586_v52, %s1191_s21 }
 0x38f   :  { %802 = vrot.lane.b32.xlu0 %v1600_v13, %s1193_s22  ;;  %764 = vrot.lane.b32.xlu1 %v1588_v53, %s1191_s21 }
 0x393   :  { %800 = vrot.lane.b32.xlu1 %v1594_v59, %s1193_s22 }
 0x397   :  { %804 = vrot.lane.b32.xlu1 %v1588_v53, %s1193_s22 }
 0x3c9   :  { %v681_v3 = vpop.permute.xlu0 %680  ;;  %v675_v27 = vpop.permute.xlu1 %674 }
 0x3ca   :  { %v685_v10 = vsel %vm105_vm0, %v681_v3, %v675_v27 }
 0x3cb   :  { %v686_v55 = vmul.f32 %v685_v10, %v1335_v12 }
 0x3cd   :  { %v657_v20 = vpop.permute.xlu0 %656  ;;  %v677_v4 = vpop.permute.xlu1 %676  ;;  %v690_v6 = vpack.c.bf16 %v686_v55, %v686_v55 }
 0x3ce   :  { %v684_v21 = vsel %vm105_vm0, %v675_v27, %v677_v4 }
 0x3cf   :  { %v687_v41 = vmul.f32 %v684_v21, %v1340_v15  ;;  %v822_v2 = vrot.slane %v690_v6, 4 }
 0x3d1   :  { %v691_v60 = vpack.c.bf16 %v687_v41, %v687_v41  ;;  %v679_v63 = vpop.permute.xlu0 %678  ;;  %v655_v5 = vpop.permute.xlu1 %654 }
 0x3d2   :  { %v664_v1 = vsel %vm62_vm1, %v655_v5, %v657_v20  ;;  %v682_v26 = vsel %vm105_vm0, %v679_v63, %v681_v3  ;;  %v683_v12 = vsel %vm105_vm0, %v677_v4, %v679_v63 }
 0x3d3   :  { %v667_v8 = vmul.f32 %v664_v1, %v1353_v24  ;;  %v823_v11 = vrot.slane %v691_v60, 4  ;;  %v689_v24 = vmul.f32 %v682_v26, %v1367_v35  ;;  %v688_v58 = vmul.f32 %v683_v12, %v1364_v34 }
 0x3d5   :  { %v671_v28 = vpack.c.bf16 %v667_v8, %v667_v8  ;;  %v717_v56 = vpop.permute.xlu0 %716  ;;  %v661_v18 = vpop.permute.xlu1 %660  ;;  %v693_v10 = vpack.c.bf16 %v689_v24, %v689_v24  ;;  %v692_v41 = vpack.c.bf16 %v688_v58, %v688_v58 }
 0x3d6   :  { %v665_v15 = vsel %vm62_vm1, %v661_v18, %v655_v5 }
 0x3d7   :  { %v666_v32 = vmul.f32 %v665_v15, %v1350_v23  ;;  %v856_v42 = vsel %vm441_vm2, %v671_v28, %v823_v11  ;;  %v825_v5 = vrot.slane %v693_v10, 4  ;;  %v824_v28 = vrot.slane %v692_v41, 4 }
 0x3d8   :  { %929 = vmatprep.subr.bf16.mxu0 %v856_v42 }
 0x3d9   :  { %v670_v48 = vpack.c.bf16 %v666_v32, %v666_v32  ;;  %v721_v49 = vpop.permute.xlu0 %720  ;;  %v715_v25 = vpop.permute.xlu1 %714 }
 0x3da   :  { %v724_v3 = vsel %vm193_vm3, %v715_v25, %v717_v56  ;;  %v725_v35 = vsel %vm193_vm3, %v721_v49, %v715_v25 }
 0x3db   :  { %v852_v27 = vsel %vm441_vm2, %v670_v48, %v822_v2  ;;  %v727_v23 = vmul.f32 %v724_v3, %v1385_v54  ;;  %v726_v1 = vmul.f32 %v725_v35, %v1396_v61 }
 0x3dc   :  { %930 = vmatpush1.bf16.msra.mxu0 %v852_v27 }
 0x3dd   :  { %v697_v4 = vpop.permute.xlu0 %696  ;;  %v659_v21 = vpop.permute.xlu1 %658  ;;  %v731_v54 = vpack.c.bf16 %v727_v23, %v727_v23 }
 0x3de   :  { %v662_v55 = vsel %vm62_vm1, %v659_v21, %v661_v18  ;;  %v663_v34 = vsel %vm62_vm1, %v657_v20, %v659_v21 }
 0x3df   :  { %v668_v60 = vmul.f32 %v663_v34, %v1370_v36  ;;  %v669_v63 = vmul.f32 %v662_v55, %v1377_v45  ;;  %v730_v45 = vpack.c.bf16 %v726_v1, %v726_v1  ;;  %v831_v12 = vrot.slane %v731_v54, 4 }
 0x3e1   :  { %v672_v8 = vpack.c.bf16 %v668_v60, %v668_v60  ;;  %v673_v6 = vpack.c.bf16 %v669_v63, %v669_v63  ;;  %v719_v11 = vpop.permute.xlu0 %718  ;;  %v695_v26 = vpop.permute.xlu1 %694  ;;  %v830_v3 = vrot.slane %v730_v45, 4 }
 0x3e2   :  { %v704_v15 = vsel %vm149_vm4, %v695_v26, %v697_v4  ;;  %v722_v61 = vsel %vm193_vm3, %v719_v11, %v721_v49 }
 0x3e3   :  { %v707_v18 = vmul.f32 %v704_v15, %v1409_v22  ;;  %v864_v20 = vsel %vm441_vm2, %v673_v6, %v825_v5  ;;  %v860_v36 = vsel %vm441_vm2, %v672_v8, %v824_v28  ;;  %v723_v22 = vsel %vm193_vm3, %v717_v56, %v719_v11 }
 0x3e4   :  { %970 = vmatprep.subr.bf16.mxu1 %v864_v20  ;;  %v729_v58 = vmul.f32 %v722_v61, %v1421_v38  ;;  %v728_v23 = vmul.f32 %v723_v22, %v1418_v37  ;;  %v735_v37 = vpack.c.bf16 %v1594_v59, %v1594_v59 }
 0x3e5   :  { %v711_v32 = vpack.c.bf16 %v707_v18, %v707_v18  ;;  %v743_v42 = vpop.permute.xlu0 %742  ;;  %971 = vmatpush1.bf16.msra.mxu1 %v860_v36  ;;  %v701_v24 = vpop.permute.xlu1 %700 }
 0x3e6   :  { %v705_v2 = vsel %vm149_vm4, %v701_v24, %v695_v26  ;;  %v733_v38 = vpack.c.bf16 %v729_v58, %v729_v58  ;;  %v732_v5 = vpack.c.bf16 %v728_v23, %v728_v23 }
 0x3e7   :  { %v706_v48 = vmul.f32 %v705_v2, %v1403_v17  ;;  %v872_v25 = vsel %vm441_vm2, %v711_v32, %v831_v12 }
 0x3e8   :  { %931 = vmatprep.subr.bf16.mxu0 %v872_v25  ;;  %v833_v26 = vrot.slane %v733_v38, 4  ;;  %v832_v45 = vrot.slane %v732_v5, 4 }
 0x3e9   :  { %v710_v27 = vpack.c.bf16 %v706_v48, %v706_v48  ;;  %v739_v49 = vpop.permute.xlu0 %738  ;;  %v741_v10 = vpop.permute.xlu1 %740 }
 0x3ea   :  { %v747_v21 = vsel %vm241_vm5, %v741_v10, %v743_v42  ;;  %v748_v41 = vsel %vm241_vm5, %v739_v49, %v741_v10 }
 0x3eb   :  { %v750_v56 = vmul.f32 %v748_v41, %v1455_v14  ;;  %v751_v17 = vmul.f32 %v747_v21, %v1439_v57  ;;  %v868_v35 = vsel %vm441_vm2, %v710_v27, %v830_v3  ;;  %v734_v57 = vpack.c.bf16 %v1586_v52, %v1586_v52 }
 0x3ec   :  { %932 = vmatpush1.bf16.msra.mxu0 %v868_v35  ;;  %v736_v3 = vpack.c.bf16 %v1600_v13, %v1600_v13 }
 0x3ed   :  { %v754_v55 = vpack.c.bf16 %v750_v56, %v750_v56  ;;  %v755_v34 = vpack.c.bf16 %v751_v17, %v751_v17  ;;  %v781_v60 = vpop.permute.xlu0 %780  ;;  %v699_v63 = vpop.permute.xlu1 %698 }
 0x3ee   :  { %v702_v1 = vsel %vm149_vm4, %v699_v63, %v701_v24  ;;  %v703_v14 = vsel %vm149_vm4, %v697_v4, %v699_v63 }
 0x3ef   :  { %v838_v54 = vrot.slane %v754_v55, 4  ;;  %v839_v8 = vrot.slane %v755_v34, 4  ;;  %v708_v6 = vmul.f32 %v703_v14, %v1424_v39  ;;  %v709_v11 = vmul.f32 %v702_v1, %v1431_v51 }
 0x3f1   :  { %v712_v28 = vpack.c.bf16 %v708_v6, %v708_v6  ;;  %v713_v15 = vpack.c.bf16 %v709_v11, %v709_v11  ;;  %v779_v59 = vpop.permute.xlu0 %778  ;;  %v745_v18 = vpop.permute.xlu1 %744  ;;  %v888_v20 = vsel %vm441_vm2, %v735_v37, %v839_v8  ;;  %v884_v36 = vsel %vm441_vm2, %v734_v57, %v838_v54 }
 0x3f2   :  { %v746_v4 = vsel %vm241_vm5, %v743_v42, %v745_v18  ;;  %v749_v52 = vsel %vm241_vm5, %v745_v18, %v739_v49  ;;  %933 = vmatprep.subr.bf16.mxu0 %v888_v20  ;;  %v788_v32 = vsel %vm329_vm6, %v779_v59, %v781_v60 }
 0x3f3   :  { %v752_v39 = vmul.f32 %v746_v4, %v1450_v9  ;;  %v753_v51 = vmul.f32 %v749_v52, %v1458_v16  ;;  %934 = vmatpush1.bf16.msra.mxu0 %v884_v36  ;;  %v880_v12 = vsel %vm441_vm2, %v713_v15, %v833_v26  ;;  %v876_v61 = vsel %vm441_vm2, %v712_v28, %v832_v45 }
 0x3f4   :  { %972 = vmatprep.subr.bf16.mxu1 %v880_v12  ;;  %v737_v9 = vpack.c.bf16 %v1588_v53, %v1588_v53  ;;  %v790_v27 = vmul.f32 %v788_v32, %v1490_v0 }
 0x3f5   :  { %v756_v24 = vpack.c.bf16 %v752_v39, %v752_v39  ;;  %v757_v2 = vpack.c.bf16 %v753_v51, %v753_v51  ;;  %v763_v42 = vpop.permute.xlu0 %762  ;;  %973 = vmatpush1.bf16.msra.mxu1 %v876_v61  ;;  %v783_v22 = vpop.permute.xlu1 %782 }
 0x3f6   :  { %v787_v48 = vsel %vm329_vm6, %v781_v60, %v783_v22  ;;  %v794_v0 = vpack.c.bf16 %v790_v27, %v790_v27 }
 0x3f7   :  { %v840_v16 = vrot.slane %v756_v24, 4  ;;  %v841_v25 = vrot.slane %v757_v2, 4  ;;  %v791_v58 = vmul.f32 %v787_v48, %v1464_v19  ;;  %v653_v24 = vld [vmem:[%s1804_s2] sm:$0xf]  ;;  %s1197_s2 = smov [#allocation7]  }
 0x3f8   :  { %v846_v1 = vrot.slane %v794_v0, 4  ;;  %s1070_s27 = sshll.u32 %s1197_s2, 4  ;;  %s1071_s27 = int_to_ptr.vmem [resolvable:$true] %s1070_s27 }
 0x3f9   :  { %v795_v49 = vpack.c.bf16 %v791_v58, %v791_v58  ;;  %v785_v10 = vpop.permute.xlu0 %784  ;;  %v761_v23 = vpop.permute.xlu1 %760  ;;  %v896_v21 = vsel %vm441_vm2, %v737_v9, %v841_v25  ;;  %v892_v41 = vsel %vm441_vm2, %v736_v3, %v840_v16  ;;  %s1155_s28 = scalar_lea.vmem %s1071_s27, 512  ;;  %p1160_p3 = scmp.lt.s32.totalorder %s1071_s27, %s1071_s27 }
 0x3fa   :  { %v786_v56 = vsel %vm329_vm6, %v783_v22, %v785_v10  ;;  %v789_v53 = vsel %vm329_vm6, %v785_v10, %v779_v59  ;;  %v767_v19 = vsel %vm285_vm7, %v761_v23, %v763_v42  ;;  %974 = vmatprep.subr.bf16.mxu1 %v896_v21  ;;  %p1156_p2 = scmp.ne.s32.totalorder %s1071_s27, %s1155_s28  ;;  %p1161_p4 = scmp.lt.s32.totalorder %s1155_s28, %s1155_s28 }
 0x3fb   :  { %v771_v13 = vmul.f32 %v767_v19, %v1504_v30  ;;  %975 = vmatpush1.bf16.msra.mxu1 %v892_v41  ;;  %v847_v17 = vrot.slane %v795_v49, 4  ;;  %v792_v35 = vmul.f32 %v786_v56, %v1520_v50  ;;  %v793_v38 = vmul.f32 %v789_v53, %v1524_v44 }
 0x3fc   :  { %p1162_p5 = por %p1161_p4, %p1160_p3 }
 0x3fd   :  { %v775_v55 = vpack.c.bf16 %v771_v13, %v771_v13  ;;  %v759_v34 = vpop.permute.xlu1 %758  ;;  %v799_v63 = vpop.permute.xlu0 %798  ;;  %v796_v30 = vpack.c.bf16 %v792_v35, %v792_v35  ;;  %v797_v14 = vpack.c.bf16 %v793_v38, %v793_v38  ;;  %v1195_v13 = vmov 2  }
 0x3fe   :  { %v768_v60 = vsel %vm285_vm7, %v759_v34, %v761_v23  ;;  %1105 = vset.pattern.permute.xlu1 %v1195_v13  ;;  %p1163_p6 = pnand %p1162_p5, %p1156_p2 }
 0x3ff   :  { %v770_v37 = vmul.f32 %v768_v60, %v1501_v29  ;;  %v904_v5 = vsel %vm441_vm2, %v775_v55, %v847_v17  ;;  %v848_v11 = vrot.slane %v796_v30, 4  ;;  %v849_v26 = vrot.slane %v797_v14, 4 }
 0x400   :  { %935 = vmatprep.subr.bf16.mxu0 %v904_v5 }
 0x401   :  { %v774_v57 = vpack.c.bf16 %v770_v37, %v770_v37  ;;  %v765_v54 = vpop.permute.xlu1 %764  ;;  %v803_v28 = vpop.permute.xlu0 %802 }
 0x402   :  { %v766_v50 = vsel %vm285_vm7, %v763_v42, %v765_v54  ;;  %v769_v44 = vsel %vm285_vm7, %v765_v54, %v759_v34 }
 0x403   :  { %v772_v8 = vmul.f32 %v766_v50, %v1511_v43  ;;  %v773_v6 = vmul.f32 %v769_v44, %v1514_v47  ;;  %v900_v29 = vsel %vm441_vm2, %v774_v57, %v846_v1 }
 0x404   :  { %936 = vmatpush1.bf16.msra.mxu0 %v900_v29 }
 0x405   :  { %v776_v15 = vpack.c.bf16 %v772_v8, %v772_v8  ;;  %v777_v59 = vpack.c.bf16 %v773_v6, %v773_v6  ;;  %v801_v18 = vpop.permute.xlu1 %800 }
 0x406   :  { %v807_v20 = vsel %vm373_vm8, %v801_v18, %v803_v28  ;;  %v808_v36 = vsel %vm373_vm8, %v799_v63, %v801_v18 }
 0x407   :  { %v810_v45 = vmul.f32 %v808_v36, %v1528_v46  ;;  %v811_v43 = vmul.f32 %v807_v20, %v1550_v33  ;;  %v912_v47 = vsel %vm441_vm2, %v777_v59, %v849_v26  ;;  %v908_v4 = vsel %vm441_vm2, %v776_v15, %v848_v11 }
 0x408   :  { %976 = vmatprep.subr.bf16.mxu1 %v912_v47 }
 0x409   :  { %v814_v52 = vpack.c.bf16 %v810_v45, %v810_v45  ;;  %v815_v39 = vpack.c.bf16 %v811_v43, %v811_v43  ;;  %977 = vmatpush1.bf16.msra.mxu1 %v908_v4  ;;  %v805_v51 = vpop.permute.xlu1 %804 }
 0x40a   :  { %v806_v12 = vsel %vm373_vm8, %v803_v28, %v805_v51  ;;  %v809_v61 = vsel %vm373_vm8, %v805_v51, %v799_v63  ;;  %v1196_v63 = vmov 3  }
 0x40b   :  { %v812_v32 = vmul.f32 %v806_v12, %v1553_v40  ;;  %v813_v46 = vmul.f32 %v809_v61, %v1545_v31  ;;  %1084 = vmatprep.subr.msk.bf16.mxu0 %vm441_vm2, %v815_v39  ;;  %v918_v33 = vsel %vm441_vm2, %v814_v52, 0  ;;  %1106 = vset.pattern.permute.xlu0 %v1196_v63 }
 0x40c   :  { %938 = vmatpush1.bf16.msra.mxu0 %v918_v33 }
 0x40d   :  { %v816_v2 = vpack.c.bf16 %v812_v32, %v812_v32  ;;  %v817_v42 = vpack.c.bf16 %v813_v46, %v813_v46 }
 0x40f   :  { %1085 = vmatmul.mubr.msk.bf16.vlgmr.msra.gmra.mrb[4].mxu0 %vm506_vm9, %v653_v24  ;;  %1086 = vmatprep.subr.msk.bf16.mxu1 %vm441_vm2, %v817_v42  ;;  %v924_v7 = vsel %vm441_vm2, %v816_v2, 0 }
 0x410   :  { %979 = vmatpush1.bf16.msra.mxu1 %v924_v7 }
 0x413   :  { %1087 = vmatmul.mubr.msk.bf16.vlgmr.msra.gmra.mrb[4].mxu1 %vm506_vm9, %v653_v24 }
 0x4e2   :  { %v963_v31 = vpop.f32.mrb[4].mxu0 }
 0x4e3   :  { %v1016_v40 = vmul.f32 %v963_v31, %v963_v31  ;;  %v965_v22 = vpop.f32.mrb[5].mxu0 }
 0x4e4   :  { %v1011_v48 = vadd.f32 %v965_v22, %v963_v31  ;;  %v1017_v9 = vmul.f32 %v965_v22, %v965_v22  ;;  %v967_v16 = vpop.f32.mrb[6].mxu0 }
 0x4e5   :  { %v968_v25 = vpop.f32.mrb[7].mxu0 }
 0x4e6   :  { %v1004_v58 = vpop.f32.mrb[4].mxu1  ;;  %v1020_v3 = vadd.f32 %v1017_v9, %v1016_v40 }
 0x4e7   :  { %v1018_v27 = vmul.f32 %v1004_v58, %v1004_v58  ;;  %v1006_v49 = vpop.f32.mrb[5].mxu1  ;;  %v1012_v10 = vadd.f32 %v1011_v48, %v1004_v58 }
 0x4e8   :  { %v1008_v23 = vpop.f32.mrb[6].mxu1  ;;  %v1019_v21 = vmul.f32 %v1006_v49, %v1006_v49 }
 0x4e9   :  { %v1009_v41 = vpop.f32.mrb[7].mxu1  ;;  %v1013_v56 = vadd.f32 %v1012_v10, %v1006_v49  ;;  %v1021_v53 = vadd.f32 %v1020_v3, %v1018_v27 }
 0x4eb   :  { %1014 = vadd.xlane.f32.xlu0 %v1013_v56  ;;  %v1022_v19 = vadd.f32 %v1021_v53, %v1019_v21 }
 0x4ed   :  { %1023 = vadd.xlane.f32.xlu1 %v1022_v19 }
 0x578   :  { %v1015_v0 = vpop.xlane.xlu0 %1014 }
 0x579   :  { %v1025_v17 = vmul.f32 0.001953125, %v1015_v0 }
 0x57a   :  { %v1024_v35 = vpop.xlane.xlu1 %1023 }
 0x57b   :  { %v1027_v38 = vmul.f32 %v1025_v17, %v1025_v17  ;;  %v1026_v55 = vmul.f32 0.001953125, %v1024_v35 }
 0x57d   :  { %v1028_v34 = vsub.f32 %v1026_v55, %v1027_v38 }
 0x57f   :  { %v1029_v60 = vadd.f32 1e-05, %v1028_v34 }
 0x581   :  { %1109 = vrsqrt.f32 %v1029_v60 }
 0x58b   :  { %v1110_v37 = vpop.eup %1109 }
 0x58c   :  { %v1031_v5 = vmul.f32 %v1110_v37, %v1581_v62 }
 0x58e   :  { %1040 = vperm.xlu1 %1105, %v1031_v5   ;;  %v1032_v1 = vmul.f32 %v1031_v5, %v1025_v17 }
 0x590   :  { %1034 = vrot.lane.b32.xlu0 %v1032_v1, %s1187_s4 }
 0x602   :  { %v1035_v30 = vpop.permute.xlu0 %1034 }
 0x603   :  { %v1037_v14 = vsub.f32 %v1581_v62, %v1035_v30 }
 0x605   :  { %1049 = vperm.xlu0 %1106, %v1037_v14  }
 0x60d   :  { %v1041_v57 = vpop.permute.xlu1 %1040 }
 0x60e   :  { %v1043_v54 = vmul.f32 %v1041_v57, %v963_v31  ;;  %v1044_v50 = vmul.f32 %v1041_v57, %v965_v22  ;;  %v1045_v44 = vmul.f32 %v1041_v57, %v1004_v58  ;;  %v1046_v8 = vmul.f32 %v1041_v57, %v1006_v49 }
 0x684   :  { %v1050_v6 = vpop.permute.xlu0 %1049 }
 0x685   :  { %v1052_v29 = vadd.f32 %v1050_v6, %v1043_v54  ;;  %v1053_v11 = vadd.f32 %v1050_v6, %v1044_v50  ;;  %v1054_v26 = vadd.f32 %v1050_v6, %v1045_v44  ;;  %v1055_v28 = vadd.f32 %v1050_v6, %v1046_v8 }
 0x687   :  { %v1056_v15 = vmax.f32 %v1052_v29, 0.0  ;;  %v1057_v59 = vmax.f32 %v1053_v11, 0.0  ;;  %v1058_v18 = vmax.f32 %v1054_v26, 0.0  ;;  %v1059_v20 = vmax.f32 %v1055_v28, 0.0 }
 0x689   :  { %1060 = vst [vmem:[#allocation7] sm:$0xff] %v1056_v15  ;;  %1061 = vst [vmem:[#allocation7 + $0x8] sm:$0xff] %v1057_v59 }
 0x68a   :  { %1062 = vst [vmem:[#allocation7 + $0x10] sm:$0xff] %v1058_v18  ;;  %1063 = vst [vmem:[#allocation7 + $0x18] sm:$0xff] %v1059_v20 }
 0x68b   :  { %1166 = shalt.err (!%p1163_p6)
}
 0x68c   :  { %s1167_s6 = scalar_lea.hbm %s1807_s5, 512 }
 0x68d   :  { %p1168_p7 = scmp.ne.s32.totalorder %s1807_s5, %s1167_s6  ;;  %p1171_p8 = scmp.lt.u32.totalorder %s1167_s6, %s1807_s5 }
 0x68f   :  { %p1173_p9 = pnand %p1171_p8, %p1168_p7 }
 0x691   :  { %1176 = shalt.err (!%p1173_p9)
}
 0x692   :  { %1073 = dma.vmem_to_hbm [thread:$0]  %s1071_s27, 512, %s1807_s5, [#allocation4]  }
 0x693   :  { %1181 = dma.done.wait [#allocation4], 512  }
 0x694   :  { %1182 = vsyncadd [#allocation4], 4294966784 }
 0x695   :  { %1077 = vsyncpa [#allocation3], 1 }
 0x696   :  { %1078 = vsyncpa [#allocation6], 1 }
 0x697   :  { %1079 = vsyncpa [#allocation4], 1 }

</bundles_post_ra>
